<compile_context>
chip_gen: v7x
topology: tpu7x:2x2x1
jax: 0.10.0
libtpu: 0.0.40
codegen_flags: <defaults>
</compile_context>

<pallas_src>
import functools

import jax
import jax.numpy as jnp
from jax.experimental import pallas as pl
from jax.experimental.pallas import tpu as pltpu


def _dice_reduce_kernel(x_ref, t_ref, out_ref, acc_it, acc_pt, *,
                        total_rows, tile_rows, blocks_per_core, needs_mask):
    """Accumulate partials for the binary EL-Dice loss.

    x_ref   : (tile_rows, cols)  logits block, native dtype
    t_ref   : (tile_rows, cols)  target block, native dtype
    out_ref : (1, 2, cols)       f32 per-core partial (row-reduced), written
                                 once at the last reduction step.
              row 0: sum(p*t) per lane column,  row 1: sum(p + t) per lane col.
    acc_it  : (tile_rows, cols)  f32 scratch, resident across the reduction.
    acc_pt  : (tile_rows, cols)  f32 scratch, resident across the reduction.
    """
    c = pl.program_id(0)          # core ("parallel") axis
    i = pl.program_id(1)          # reduction ("arbitrary") axis
    n_i = pl.num_programs(1)

    @pl.when(i == 0)
    def _init():
        acc_it[...] = jnp.zeros_like(acc_it)
        acc_pt[...] = jnp.zeros_like(acc_pt)

    # Cast in-kernel: HBM traffic stays at the native dtype width.
    x = x_ref[...].astype(jnp.float32)
    t = t_ref[...].astype(jnp.float32)
    p = 1.0 / (1.0 + jnp.exp(-x))          # sigmoid: EUP exp + divide

    if needs_mask:
        # Global row index of this block (unclamped, so overhanging and
        # duplicated tail blocks are fully masked out).  NaN/Inf garbage in
        # the padded region is neutralized here (jnp.where is select-based).
        row0 = (c * blocks_per_core + i) * tile_rows
        ridx = row0 + jax.lax.broadcasted_iota(jnp.int32, x_ref.shape, 0)
        valid = ridx < total_rows
        p = jnp.where(valid, p, 0.0)
        t = jnp.where(valid, t, 0.0)

    # Pure VPU adds into the resident scratch -- no cross-lane work and no
    # stores to the pipelined output in the hot loop.
    acc_it[...] += p * t
    acc_pt[...] += p + t

    @pl.when(i == n_i - 1)
    def _finalize():
        # One sublane (XLU) reduction per core at the very end; only a
        # (2, cols) f32 sliver ever goes back to HBM.
        out_ref[0, 0:1, :] = jnp.sum(acc_it[...], axis=0, keepdims=True)
        out_ref[0, 1:2, :] = jnp.sum(acc_pt[...], axis=0, keepdims=True)


def _round_up(x, m):
    return ((x + m - 1) // m) * m


def _pick_tile_rows(rows, cols, in_itemsize_bytes, *,
                    budget_bytes=24 * 1024 * 1024, cap=16384):
    """Largest row-tile whose VMEM footprint stays well under the scoped limit.

    Per lane-padded element:
      inputs : 2 buffers (double-buffered pipeline) x native itemsizes
      scratch: 2 f32 accumulator planes (single-buffered)
    Budgeted to be safe on v7x (64 MiB physical VMEM) as well as v5e/v6e.
    """
    cols_pad = _round_up(max(1, cols), 128)
    per_row = cols_pad * (2 * in_itemsize_bytes + 2 * 4)
    tr = max(8, min(budget_bytes // per_row, cap))
    tr -= tr % 8
    tr = max(tr, 8)
    if rows <= tr:
        return rows                    # single block == full extent (legal)
    return tr
    # TODO(synk): if the minor dim alone exceeds the VMEM budget, the last dim
    # would also need tiling; not needed for typical segmentation shapes.


def _dice_partial_sums(logits, targets, *, tile_rows=None):
    """Pallas reduction returning (sum(p*t), sum(p) + sum(t)) as f32 scalars."""
    cols = logits.shape[-1]
    rows = logits.size // cols
    # Free reshapes: collapse leading dims only, keep the native minor dim, so
    # no HBM relayout / padding pass is ever materialized.
    x2 = logits.reshape(rows, cols)
    t2 = targets.reshape(rows, cols)

    itembytes = x2.dtype.itemsize + t2.dtype.itemsize
    tr = tile_rows if tile_rows is not None else _pick_tile_rows(rows, cols,
                                                                 itembytes)
    tr = min(tr, rows)
    n_blocks = pl.cdiv(rows, tr)
    n_cores = 2 if n_blocks > 1 else 1     # shard reduction over v7x's 2 TCs
    bpc = pl.cdiv(n_blocks, n_cores)       # row-blocks per core
    # Masking compiled out entirely when the tiling covers the rows exactly.
    needs_mask = (rows % tr != 0) or (n_cores * bpc != n_blocks)

    def in_map(c, i):
        # Clamp so a (rare) overhanging block re-reads the last valid block;
        # its contribution is masked to zero inside the kernel.
        return (jnp.minimum(c * bpc + i, n_blocks - 1), 0)

    kernel = functools.partial(
        _dice_reduce_kernel,
        total_rows=rows, tile_rows=tr, blocks_per_core=bpc,
        needs_mask=needs_mask)

    acc = pl.pallas_call(
        kernel,
        out_shape=jax.ShapeDtypeStruct((n_cores, 2, cols), jnp.float32),
        grid_spec=pltpu.PrefetchScalarGridSpec(
            num_scalar_prefetch=0,
            grid=(n_cores, bpc),
            in_specs=[
                pl.BlockSpec((tr, cols), in_map),
                pl.BlockSpec((tr, cols), in_map),
            ],
            out_specs=pl.BlockSpec((1, 2, cols), lambda c, i: (c, 0, 0)),
            scratch_shapes=[
                pltpu.VMEM((tr, cols), jnp.float32),
                pltpu.VMEM((tr, cols), jnp.float32),
            ],
        ),
        compiler_params=pltpu.CompilerParams(
            dimension_semantics=("parallel", "arbitrary"),
            vmem_limit_bytes=48 * 1024 * 1024,
        ),
    )(x2, t2)

    # Final tiny cross-lane/core reduction on the (n_cores, 2, cols) partials.
    inter = jnp.sum(acc[:, 0, :])
    p_plus_t = jnp.sum(acc[:, 1, :])
    return inter, p_plus_t


@functools.partial(jax.jit, static_argnames=("smooth", "eps", "tile_rows"))
def binary_el_dice_loss(y_pred_logits, y_true, *, smooth=1e-5, eps=1e-7,
                        tile_rows=None):
    """JAX/Pallas equivalent of BinaryELDiceLoss.forward."""
    inter, p_plus_t = _dice_partial_sums(y_pred_logits, y_true,
                                         tile_rows=tile_rows)
    dsc = (2.0 * inter + smooth) / jnp.maximum(p_plus_t + smooth, eps)
    # torch: clamp(pow(-log(dsc + smooth), 0.3).mean(), 0, 2); .mean() of a
    # 0-d tensor is itself, so the epilogue is a pure scalar expression.
    return jnp.clip(jnp.power(-jnp.log(dsc + smooth), 0.3), 0.0, 2.0)


def _reference_loss(y_pred_logits, y_true, smooth=1e-5, eps=1e-7):
    """Pure-JAX reference mirroring the PyTorch forward."""
    bs = y_true.shape[0]
    c = y_pred_logits.shape[1]
    y_pred = jax.nn.sigmoid(y_pred_logits.astype(jnp.float32)).reshape(bs, c, -1)
    y_t = y_true.astype(jnp.float32).reshape(bs, c, -1)
    inter = jnp.sum(y_pred * y_t)
    denom = jnp.maximum(jnp.sum(y_pred) + jnp.sum(y_t) + smooth, eps)
    dsc = (2.0 * inter + smooth) / denom
    return jnp.clip(jnp.power(-jnp.log(dsc + smooth), 0.3), 0.0, 2.0)


if __name__ == "__main__":
    key = jax.random.PRNGKey(0)
    k1, k2, k3, k4 = jax.random.split(key, 4)

    # Case 1: (B, C, H, W) float32 logits with one-hot binary targets.
    B, C, H, W = 2, 4, 16, 16
    logits = jax.random.normal(k1, (B, C, H, W), dtype=jnp.float32)
    labels = jax.random.randint(k2, (B, H, W), 0, C, dtype=jnp.int32)
    y_true = jnp.transpose(jax.nn.one_hot(labels, C, dtype=jnp.float32),
                           (0, 3, 1, 2))                        # (B, C, H, W)

    loss = jax.block_until_ready(binary_el_dice_loss(logits, y_true))
    ref = _reference_loss(logits, y_true)
    assert jnp.allclose(loss, ref, rtol=1e-5, atol=1e-6), (loss, ref)

    # Case 2: bf16 logits, ragged row count, small forced tile -> exercises the
    # in-kernel tail masking, multi-step accumulation, and the 2-core split.
    B2, C2, H2, W2 = 3, 4, 37, 24
    logits2 = jax.random.normal(k3, (B2, C2, H2, W2), dtype=jnp.bfloat16)
    y_true2 = (jax.random.uniform(k4, (B2, C2, H2, W2)) > 0.7).astype(jnp.float32)
    loss2 = jax.block_until_ready(
        binary_el_dice_loss(logits2, y_true2, tile_rows=64))
    ref2 = _reference_loss(logits2.astype(jnp.float32), y_true2)
    assert jnp.allclose(loss2, ref2, rtol=2e-3, atol=1e-4), (loss2, ref2)

    print("KERNEL_OK")
</pallas_src>

<mosaic_0001>
module attributes {stable_mosaic.version = 11 : i64} {
  func.func @_dice_reduce_kernel(%arg0: i32, %arg1: i32, %arg2: memref<128x16xf32, #tpu.memory_space<vmem>>, %arg3: memref<128x16xf32, #tpu.memory_space<vmem>>, %arg4: memref<1x2x16xf32, #tpu.memory_space<vmem>>, %arg5: memref<128x16xf32, #tpu.memory_space<vmem>>, %arg6: memref<128x16xf32, #tpu.memory_space<vmem>>) attributes {dimension_semantics = [#tpu.dimension_semantics<parallel>, #tpu.dimension_semantics<arbitrary>], iteration_bounds = array<i64: 1, 1>, scalar_prefetch = 0 : i64, scratch_operands = 2 : i64, tpu.core_type = #tpu.core_type<tc>, window_params = [{transform_indices = @transform_0, window_bounds = array<i64: 128, 16>}, {transform_indices = @transform_1, window_bounds = array<i64: 128, 16>}, {transform_indices = @transform_2, window_bounds = array<i64: 1, 2, 16>}]} {
    %c0_i32 = arith.constant 0 : i32
    %0 = arith.cmpi eq, %arg1, %c0_i32 : i32
    %1 = arith.extui %0 : i1 to i32
    %c0_i32_0 = arith.constant 0 : i32
    %2 = arith.cmpi ne, %1, %c0_i32_0 : i32
    scf.if %2 {
      %cst_16 = arith.constant 0.000000e+00 : f32
      %23 = vector.broadcast %cst_16 : f32 to vector<128x16xf32>
      %c0_17 = arith.constant 0 : index
      %c0_18 = arith.constant 0 : index
      %24 = vector.load %arg5[%c0_17, %c0_18] : memref<128x16xf32, #tpu.memory_space<vmem>>, vector<128x16xf32>
      tpu.vector_store %arg5[%c0_17, %c0_18], %23 {strides = array<i32>} : memref<128x16xf32, #tpu.memory_space<vmem>>, vector<128x16xf32>,
      %cst_19 = arith.constant 0.000000e+00 : f32
      %25 = vector.broadcast %cst_19 : f32 to vector<128x16xf32>
      %c0_20 = arith.constant 0 : index
      %c0_21 = arith.constant 0 : index
      %26 = vector.load %arg6[%c0_20, %c0_21] : memref<128x16xf32, #tpu.memory_space<vmem>>, vector<128x16xf32>
      tpu.vector_store %arg6[%c0_20, %c0_21], %25 {strides = array<i32>} : memref<128x16xf32, #tpu.memory_space<vmem>>, vector<128x16xf32>,
    } else {
    }
    %c0 = arith.constant 0 : index
    %c0_1 = arith.constant 0 : index
    %3 = vector.load %arg2[%c0, %c0_1] : memref<128x16xf32, #tpu.memory_space<vmem>>, vector<128x16xf32>
    %c0_2 = arith.constant 0 : index
    %c0_3 = arith.constant 0 : index
    %4 = vector.load %arg3[%c0_2, %c0_3] : memref<128x16xf32, #tpu.memory_space<vmem>>, vector<128x16xf32>
    %cst = arith.constant 0.000000e+00 : f32
    %5 = vector.broadcast %cst : f32 to vector<128x16xf32>
    %6 = arith.subf %5, %3 : vector<128x16xf32>
    %7 = math.exp %6 : vector<128x16xf32>
    %cst_4 = arith.constant 1.000000e+00 : f32
    %8 = vector.broadcast %cst_4 : f32 to vector<128x16xf32>
    %9 = arith.addf %8, %7 : vector<128x16xf32>
    %cst_5 = arith.constant 1.000000e+00 : f32
    %10 = vector.broadcast %cst_5 : f32 to vector<128x16xf32>
    %11 = arith.divf %10, %9 : vector<128x16xf32>
    %c0_6 = arith.constant 0 : index
    %c0_7 = arith.constant 0 : index
    %12 = vector.load %arg5[%c0_6, %c0_7] : memref<128x16xf32, #tpu.memory_space<vmem>>, vector<128x16xf32>
    %13 = arith.mulf %11, %4 : vector<128x16xf32>
    %14 = arith.addf %12, %13 : vector<128x16xf32>
    %c0_8 = arith.constant 0 : index
    %c0_9 = arith.constant 0 : index
    %15 = vector.load %arg5[%c0_8, %c0_9] : memref<128x16xf32, #tpu.memory_space<vmem>>, vector<128x16xf32>
    tpu.vector_store %arg5[%c0_8, %c0_9], %14 {strides = array<i32>} : memref<128x16xf32, #tpu.memory_space<vmem>>, vector<128x16xf32>,
    %c0_10 = arith.constant 0 : index
    %c0_11 = arith.constant 0 : index
    %16 = vector.load %arg6[%c0_10, %c0_11] : memref<128x16xf32, #tpu.memory_space<vmem>>, vector<128x16xf32>
    %17 = arith.addf %11, %4 : vector<128x16xf32>
    %18 = arith.addf %16, %17 : vector<128x16xf32>
    %c0_12 = arith.constant 0 : index
    %c0_13 = arith.constant 0 : index
    %19 = vector.load %arg6[%c0_12, %c0_13] : memref<128x16xf32, #tpu.memory_space<vmem>>, vector<128x16xf32>
    tpu.vector_store %arg6[%c0_12, %c0_13], %18 {strides = array<i32>} : memref<128x16xf32, #tpu.memory_space<vmem>>, vector<128x16xf32>,
    %c0_i32_14 = arith.constant 0 : i32
    %20 = arith.cmpi eq, %arg1, %c0_i32_14 : i32
    %21 = arith.extui %20 : i1 to i32
    %c0_i32_15 = arith.constant 0 : i32
    %22 = arith.cmpi ne, %21, %c0_i32_15 : i32
    scf.if %22 {
      %c0_16 = arith.constant 0 : index
      %c0_17 = arith.constant 0 : index
      %23 = vector.load %arg5[%c0_16, %c0_17] : memref<128x16xf32, #tpu.memory_space<vmem>>, vector<128x16xf32>
      %cst_18 = arith.constant dense<0.000000e+00> : vector<16xf32>
      %24 = vector.multi_reduction <add>, %23, %cst_18 [0] : vector<128x16xf32> to vector<16xf32>
      %25 = vector.shape_cast %24 : vector<16xf32> to vector<1x16xf32>
      %c0_19 = arith.constant 0 : index
      %c0_20 = arith.constant 0 : index
      %c0_21 = arith.constant 0 : index
      %26 = vector.load %arg4[%c0_19, %c0_20, %c0_21] : memref<1x2x16xf32, #tpu.memory_space<vmem>>, vector<1x1x16xf32>
      %27 = vector.shape_cast %26 : vector<1x1x16xf32> to vector<1x16xf32>
      %28 = vector.shape_cast %25 : vector<1x16xf32> to vector<1x1x16xf32>
      tpu.vector_store %arg4[%c0_19, %c0_20, %c0_21], %28 {strides = array<i32>} : memref<1x2x16xf32, #tpu.memory_space<vmem>>, vector<1x1x16xf32>,
      %c0_22 = arith.constant 0 : index
      %c0_23 = arith.constant 0 : index
      %29 = vector.load %arg6[%c0_22, %c0_23] : memref<128x16xf32, #tpu.memory_space<vmem>>, vector<128x16xf32>
      %cst_24 = arith.constant dense<0.000000e+00> : vector<16xf32>
      %30 = vector.multi_reduction <add>, %29, %cst_24 [0] : vector<128x16xf32> to vector<16xf32>
      %31 = vector.shape_cast %30 : vector<16xf32> to vector<1x16xf32>
      %c0_25 = arith.constant 0 : index
      %c1 = arith.constant 1 : index
      %c0_26 = arith.constant 0 : index
      %32 = vector.load %arg4[%c0_25, %c1, %c0_26] : memref<1x2x16xf32, #tpu.memory_space<vmem>>, vector<1x1x16xf32>
      %33 = vector.shape_cast %32 : vector<1x1x16xf32> to vector<1x16xf32>
      %34 = vector.shape_cast %31 : vector<1x16xf32> to vector<1x1x16xf32>
      tpu.vector_store %arg4[%c0_25, %c1, %c0_26], %34 {strides = array<i32>} : memref<1x2x16xf32, #tpu.memory_space<vmem>>, vector<1x1x16xf32>,
    } else {
    }
    return
  }
  func.func @transform_0(%arg0: i32, %arg1: i32) -> (i32, i32) {
    %c1_i32 = arith.constant 1 : i32
    %0 = arith.muli %arg0, %c1_i32 : i32
    %1 = arith.addi %0, %arg1 : i32
    %c0_i32 = arith.constant 0 : i32
    %2 = arith.minsi %1, %c0_i32 : i32
    %c0_i32_0 = arith.constant 0 : i32
    %c0_i32_1 = arith.constant 0 : i32
    return %2, %c0_i32_0 : i32, i32
  }
  func.func @transform_1(%arg0: i32, %arg1: i32) -> (i32, i32) {
    %c1_i32 = arith.constant 1 : i32
    %0 = arith.muli %arg0, %c1_i32 : i32
    %1 = arith.addi %0, %arg1 : i32
    %c0_i32 = arith.constant 0 : i32
    %2 = arith.minsi %1, %c0_i32 : i32
    %c0_i32_0 = arith.constant 0 : i32
    %c0_i32_1 = arith.constant 0 : i32
    return %2, %c0_i32_0 : i32, i32
  }
  func.func @transform_2(%arg0: i32, %arg1: i32) -> (i32, i32, i32) {
    %c0_i32 = arith.constant 0 : i32
    %c0_i32_0 = arith.constant 0 : i32
    %c0_i32_1 = arith.constant 0 : i32
    return %arg0, %c0_i32, %c0_i32_0 : i32, i32, i32
  }
}

</mosaic_0001>

<bundles_post_ra>
// kernel: binary_el_dice_loss.1
= control target key start
LH: loop header
LB: loop body
LE: loop exit
PB: predicated region body
PF: predicated region fallthrough
CT: control target
= control target key end

     0   :  { %7 = vsyncpa [#allocation5], 0  ;;  %s738_s0 = inlined_call_operand.hbm [shape: f32[128,16], index: 0, kind: input, shape index: {}]   ;;  %s739_s1 = inlined_call_operand.hbm [shape: f32[128,16], index: 1, kind: input, shape index: {}]   ;;  %s740_s2 = inlined_call_operand.vmem [shape: f32[1,2,16], index: 2, kind: output, shape index: {}]  }
   0x1   :  { %8 = vsyncpa [#allocation7], 0  ;;  %s592_s9 = smov [#allocation4]   ;;  %s544_s13 = scalar_lea.hbm %s738_s0, 2048 }
   0x2   :  { %s20_s10 = sshll.u32 %s592_s9, 4  ;;  %p545_p0 = scmp.ne.s32.totalorder %s738_s0, %s544_s13  ;;  %s21_s10 = int_to_ptr.vmem [resolvable:$true] %s20_s10 }
   0x3   :  { %p548_p1 = scmp.lt.u32.totalorder %s544_s13, %s738_s0 }
   0x5   :  { %p550_p2 = pnand %p548_p1, %p545_p0 }
   0x7   :  { %553 = shalt.err (!%p550_p2)
}
   0x8   :  { %s554_s18 = scalar_lea.vmem %s21_s10, 2048  ;;  %p559_p4 = scmp.lt.s32.totalorder %s21_s10, %s21_s10 }
   0x9   :  { %p555_p3 = scmp.ne.s32.totalorder %s21_s10, %s554_s18  ;;  %p560_p5 = scmp.lt.s32.totalorder %s554_s18, %s554_s18 }
   0xb   :  { %p561_p6 = por %p560_p5, %p559_p4 }
   0xd   :  { %p562_p7 = pnand %p561_p6, %p555_p3 }
   0xf   :  { %565 = shalt.err (!%p562_p7)
}
  0x10   :  { %s593_s19 = smov 128   ;;  %s594_s20 = smov 8  }
  0x11   :  { %26 = dma.hbm_to_vmem [thread:$0]  %s738_s0, 2048, %s21_s10, [#allocation5], %s593_s19, %s593_s19, %s594_s20  }
  0x12   :  { %s595_s23 = smov [#allocation6]   ;;  %s566_s27 = scalar_lea.hbm %s739_s1, 2048 }
  0x13   :  { %s38_s24 = sshll.u32 %s595_s23, 4  ;;  %p567_p8 = scmp.ne.s32.totalorder %s739_s1, %s566_s27  ;;  %s39_s24 = int_to_ptr.vmem [resolvable:$true] %s38_s24 }
  0x14   :  { %p570_p9 = scmp.lt.u32.totalorder %s566_s27, %s739_s1 }
  0x16   :  { %p572_p10 = pnand %p570_p9, %p567_p8 }
  0x18   :  { %575 = shalt.err (!%p572_p10)
}
  0x19   :  { %s576_s4 = scalar_lea.vmem %s39_s24, 2048  ;;  %p581_p12 = scmp.lt.s32.totalorder %s39_s24, %s39_s24 }
  0x1a   :  { %p577_p11 = scmp.ne.s32.totalorder %s39_s24, %s576_s4  ;;  %p582_p13 = scmp.lt.s32.totalorder %s576_s4, %s576_s4 }
  0x1c   :  { %p583_p0 = por %p582_p13, %p581_p12 }
  0x1e   :  { %p584_p1 = pnand %p583_p0, %p577_p11 }
  0x20   :  { %587 = shalt.err (!%p584_p1)
}
  0x21   :  { %44 = dma.hbm_to_vmem [thread:$0]  %s739_s1, 2048, %s39_s24, [#allocation7], %s593_s19, %s593_s19, %s594_s20  }
  0x22   :  { %588 = dma.done.wait [#allocation5], 2048  }
  0x23   :  { %589 = vsyncadd [#allocation5], 4294965248 }
  0x24   :  { %590 = dma.done.wait [#allocation7], 2048  }
  0x25   :  { %591 = vsyncadd [#allocation7], 4294965248  ;;  %vm63_vm0 = vcmask 130048   ;;  %v596_v0 = vmov 0.0   ;;  %v96_v1 = vld [vmem:[#allocation4] sm:$0xff]  ;;  %v97_v2 = vld [vmem:[#allocation4 + $0x8] sm:$0xff] }
  0x26   :  { %64 = vst.msk [vmem:[#allocation2] sm:$0xff] %vm63_vm0, %v596_v0  ;;  %65 = vst.msk [vmem:[#allocation2 + $0x8] sm:$0xff] %vm63_vm0, %v596_v0  ;;  %v128_v3 = vsub.f32 0.0, %v96_v1  ;;  %v129_v4 = vsub.f32 0.0, %v97_v2  ;;  %v98_v5 = vld [vmem:[#allocation4 + $0x10] sm:$0xff]  ;;  %v99_v9 = vld [vmem:[#allocation4 + $0x18] sm:$0xff] }
  0x27   :  { %66 = vst.msk [vmem:[#allocation2 + $0x10] sm:$0xff] %vm63_vm0, %v596_v0  ;;  %67 = vst.msk [vmem:[#allocation2 + $0x18] sm:$0xff] %vm63_vm0, %v596_v0  ;;  %v130_v8 = vsub.f32 0.0, %v98_v5  ;;  %v131_v11 = vsub.f32 0.0, %v99_v9  ;;  %v100_v12 = vld [vmem:[#allocation4 + $0x20] sm:$0xff]  ;;  %v101_v15 = vld [vmem:[#allocation4 + $0x28] sm:$0xff] }
  0x28   :  { %68 = vst.msk [vmem:[#allocation2 + $0x20] sm:$0xff] %vm63_vm0, %v596_v0  ;;  %69 = vst.msk [vmem:[#allocation2 + $0x28] sm:$0xff] %vm63_vm0, %v596_v0  ;;  %v144_v6 = vmul.f32 1.442695, %v128_v3  ;;  %v146_v7 = vmul.f32 1.442695, %v129_v4 }
  0x29   :  { %70 = vst.msk [vmem:[#allocation2 + $0x30] sm:$0xff] %vm63_vm0, %v596_v0  ;;  %71 = vst.msk [vmem:[#allocation2 + $0x38] sm:$0xff] %vm63_vm0, %v596_v0  ;;  %v148_v10 = vmul.f32 1.442695, %v130_v8  ;;  %v150_v13 = vmul.f32 1.442695, %v131_v11 }
  0x2a   :  { %72 = vst.msk [vmem:[#allocation2 + $0x40] sm:$0xff] %vm63_vm0, %v596_v0  ;;  %73 = vst.msk [vmem:[#allocation2 + $0x48] sm:$0xff] %vm63_vm0, %v596_v0  ;;  %480 = vpow2.f32 %v144_v6  ;;  %v132_v14 = vsub.f32 0.0, %v100_v12  ;;  %v133_v16 = vsub.f32 0.0, %v101_v15  ;;  %v102_v17 = vld [vmem:[#allocation4 + $0x30] sm:$0xff]  ;;  %v103_v21 = vld [vmem:[#allocation4 + $0x38] sm:$0xff] }
  0x2b   :  { %74 = vst.msk [vmem:[#allocation2 + $0x50] sm:$0xff] %vm63_vm0, %v596_v0  ;;  %75 = vst.msk [vmem:[#allocation2 + $0x58] sm:$0xff] %vm63_vm0, %v596_v0  ;;  %482 = vpow2.f32 %v146_v7  ;;  %v134_v19 = vsub.f32 0.0, %v102_v17  ;;  %v135_v23 = vsub.f32 0.0, %v103_v21  ;;  %v104_v24 = vld [vmem:[#allocation4 + $0x40] sm:$0xff]  ;;  %v105_v26 = vld [vmem:[#allocation4 + $0x48] sm:$0xff] }
  0x2c   :  { %76 = vst.msk [vmem:[#allocation2 + $0x60] sm:$0xff] %vm63_vm0, %v596_v0  ;;  %77 = vst.msk [vmem:[#allocation2 + $0x68] sm:$0xff] %vm63_vm0, %v596_v0  ;;  %484 = vpow2.f32 %v148_v10  ;;  %v152_v18 = vmul.f32 1.442695, %v132_v14  ;;  %v154_v20 = vmul.f32 1.442695, %v133_v16 }
  0x2d   :  { %78 = vst.msk [vmem:[#allocation2 + $0x70] sm:$0xff] %vm63_vm0, %v596_v0  ;;  %79 = vst.msk [vmem:[#allocation2 + $0x78] sm:$0xff] %vm63_vm0, %v596_v0  ;;  %486 = vpow2.f32 %v150_v13  ;;  %v156_v22 = vmul.f32 1.442695, %v134_v19  ;;  %v136_v25 = vsub.f32 0.0, %v104_v24  ;;  %v137_v28 = vsub.f32 0.0, %v105_v26 }
  0x2e   :  { %80 = vst.msk [vmem:[#allocation3] sm:$0xff] %vm63_vm0, %v596_v0  ;;  %81 = vst.msk [vmem:[#allocation3 + $0x8] sm:$0xff] %vm63_vm0, %v596_v0  ;;  %488 = vpow2.f32 %v152_v18  ;;  %v158_v27 = vmul.f32 1.442695, %v135_v23  ;;  %v106_v30 = vld [vmem:[#allocation4 + $0x50] sm:$0xff]  ;;  %v107_v34 = vld [vmem:[#allocation4 + $0x58] sm:$0xff] }
  0x2f   :  { %82 = vst.msk [vmem:[#allocation3 + $0x10] sm:$0xff] %vm63_vm0, %v596_v0  ;;  %83 = vst.msk [vmem:[#allocation3 + $0x18] sm:$0xff] %vm63_vm0, %v596_v0  ;;  %490 = vpow2.f32 %v154_v20  ;;  %v160_v29 = vmul.f32 1.442695, %v136_v25  ;;  %v162_v32 = vmul.f32 1.442695, %v137_v28 }
  0x30   :  { %84 = vst.msk [vmem:[#allocation3 + $0x20] sm:$0xff] %vm63_vm0, %v596_v0  ;;  %85 = vst.msk [vmem:[#allocation3 + $0x28] sm:$0xff] %vm63_vm0, %v596_v0  ;;  %492 = vpow2.f32 %v156_v22  ;;  %v138_v33 = vsub.f32 0.0, %v106_v30  ;;  %v139_v37 = vsub.f32 0.0, %v107_v34  ;;  %v108_v38 = vld [vmem:[#allocation4 + $0x60] sm:$0xff]  ;;  %v109_v48 = vld [vmem:[#allocation4 + $0x68] sm:$0xff] }
  0x31   :  { %86 = vst.msk [vmem:[#allocation3 + $0x30] sm:$0xff] %vm63_vm0, %v596_v0  ;;  %87 = vst.msk [vmem:[#allocation3 + $0x38] sm:$0xff] %vm63_vm0, %v596_v0  ;;  %494 = vpow2.f32 %v158_v27  ;;  %v140_v45 = vsub.f32 0.0, %v108_v38  ;;  %v141_v55 = vsub.f32 0.0, %v109_v48  ;;  %v112_v58 = vld [vmem:[#allocation6] sm:$0xff]  ;;  %v113_v61 = vld [vmem:[#allocation6 + $0x8] sm:$0xff] }
  0x32   :  { %88 = vst.msk [vmem:[#allocation3 + $0x40] sm:$0xff] %vm63_vm0, %v596_v0  ;;  %89 = vst.msk [vmem:[#allocation3 + $0x48] sm:$0xff] %vm63_vm0, %v596_v0  ;;  %496 = vpow2.f32 %v160_v29  ;;  %v164_v41 = vmul.f32 1.442695, %v138_v33  ;;  %v166_v44 = vmul.f32 1.442695, %v139_v37 }
  0x33   :  { %90 = vst.msk [vmem:[#allocation3 + $0x50] sm:$0xff] %vm63_vm0, %v596_v0  ;;  %91 = vst.msk [vmem:[#allocation3 + $0x58] sm:$0xff] %vm63_vm0, %v596_v0  ;;  %498 = vpow2.f32 %v162_v32  ;;  %v168_v53 = vmul.f32 1.442695, %v140_v45  ;;  %v110_v63 = vld [vmem:[#allocation4 + $0x70] sm:$0xff]  ;;  %v224_v1 = vld [vmem:[#allocation2] sm:$0xff] }
  0x34   :  { %92 = vst.msk [vmem:[#allocation3 + $0x60] sm:$0xff] %vm63_vm0, %v596_v0  ;;  %93 = vst.msk [vmem:[#allocation3 + $0x68] sm:$0xff] %vm63_vm0, %v596_v0  ;;  %v481_v31 = vpop.eup %480  ;;  %v114_v3 = vld [vmem:[#allocation6 + $0x10] sm:$0xff]  ;;  %v170_v5 = vmul.f32 1.442695, %v141_v55  ;;  %v225_v8 = vld [vmem:[#allocation2 + $0x8] sm:$0xff] }
  0x35   :  { %94 = vst.msk [vmem:[#allocation3 + $0x70] sm:$0xff] %vm63_vm0, %v596_v0  ;;  %95 = vst.msk [vmem:[#allocation3 + $0x78] sm:$0xff] %vm63_vm0, %v596_v0  ;;  %v483_v35 = vpop.eup %482  ;;  %v176_v36 = vadd.f32 1.0, %v481_v31  ;;  %v289_v2 = vld [vmem:[#allocation3] sm:$0xff]  ;;  %v290_v10 = vld [vmem:[#allocation3 + $0x8] sm:$0xff]  ;;  %v142_v17 = vsub.f32 0.0, %v110_v63 }
  0x36   :  { %v485_v39 = vpop.eup %484  ;;  %v177_v40 = vadd.f32 1.0, %v483_v35  ;;  %v226_v14 = vld [vmem:[#allocation2 + $0x10] sm:$0xff]  ;;  %v115_v16 = vld [vmem:[#allocation6 + $0x18] sm:$0xff]  ;;  %v116_v28 = vld [vmem:[#allocation6 + $0x20] sm:$0xff]  ;;  %vm409_vm1 = vcmask 122880  }
  0x37   :  { %500 = vrcp.f32 %v176_v36  ;;  %v178_v42 = vadd.f32 1.0, %v485_v39  ;;  %v487_v43 = vpop.eup %486  ;;  %v291_v15 = vld [vmem:[#allocation3 + $0x10] sm:$0xff]  ;;  %v227_v26 = vld [vmem:[#allocation2 + $0x18] sm:$0xff]  ;;  %v117_v35 = vld [vmem:[#allocation6 + $0x28] sm:$0xff] }
  0x38   :  { %502 = vrcp.f32 %v177_v40  ;;  %v179_v46 = vadd.f32 1.0, %v487_v43  ;;  %v489_v47 = vpop.eup %488  ;;  %v292_v27 = vld [vmem:[#allocation3 + $0x18] sm:$0xff]  ;;  %v228_v38 = vld [vmem:[#allocation2 + $0x20] sm:$0xff]  ;;  %v118_v40 = vld [vmem:[#allocation6 + $0x30] sm:$0xff] }
  0x39   :  { %504 = vrcp.f32 %v178_v42  ;;  %v491_v49 = vpop.eup %490  ;;  %v180_v50 = vadd.f32 1.0, %v489_v47  ;;  %v111_v36 = vld [vmem:[#allocation4 + $0x78] sm:$0xff]  ;;  %v293_v39 = vld [vmem:[#allocation3 + $0x20] sm:$0xff]  ;;  %v172_v42 = vmul.f32 1.442695, %v142_v17  ;;  %v229_v48 = vld [vmem:[#allocation2 + $0x28] sm:$0xff] }
  0x3a   :  { %506 = vpow2.f32 %v164_v41  ;;  %v493_v51 = vpop.eup %492  ;;  %v181_v52 = vadd.f32 1.0, %v491_v49  ;;  %v294_v49 = vld [vmem:[#allocation3 + $0x28] sm:$0xff]  ;;  %v119_v55 = vld [vmem:[#allocation6 + $0x38] sm:$0xff] }
  0x3b   :  { %508 = vrcp.f32 %v179_v46  ;;  %v182_v54 = vadd.f32 1.0, %v493_v51  ;;  %v495_v56 = vpop.eup %494 }
  0x3c   :  { %510 = vpow2.f32 %v166_v44  ;;  %v497_v57 = vpop.eup %496  ;;  %v183_v59 = vadd.f32 1.0, %v495_v56  ;;  %v143_v56 = vsub.f32 0.0, %v111_v36  ;;  %v233_v36 = vld [vmem:[#allocation2 + $0x48] sm:$0xff] }
  0x3d   :  { %512 = vrcp.f32 %v180_v50  ;;  %v499_v60 = vpop.eup %498  ;;  %v184_v62 = vadd.f32 1.0, %v497_v57 }
  0x3e   :  { %514 = vrcp.f32 %v181_v52  ;;  %v185_v4 = vadd.f32 1.0, %v499_v60  ;;  %v174_v17 = vmul.f32 1.442695, %v143_v56 }
  0x3f   :  { %516 = vrcp.f32 %v182_v54  ;;  %v295_v54 = vld [vmem:[#allocation3 + $0x30] sm:$0xff] }
  0x40   :  { %518 = vpow2.f32 %v168_v53  ;;  %v230_v53 = vld [vmem:[#allocation2 + $0x30] sm:$0xff] }
  0x41   :  { %v501_v0 = vpop.eup %500  ;;  %520 = vrcp.f32 %v183_v59 }
  0x42   :  { %v503_v6 = vpop.eup %502  ;;  %v240_v7 = vmul.f32 %v501_v0, %v112_v58  ;;  %v305_v9 = vadd.f32 %v501_v0, %v112_v58  ;;  %522 = vrcp.f32 %v184_v62  ;;  %v120_v62 = vld [vmem:[#allocation6 + $0x40] sm:$0xff] }
  0x43   :  { %v505_v11 = vpop.eup %504  ;;  %v241_v12 = vmul.f32 %v503_v6, %v113_v61  ;;  %v306_v13 = vadd.f32 %v503_v6, %v113_v61  ;;  %524 = vrcp.f32 %v185_v4 }
  0x44   :  { %v507_v18 = vpop.eup %506  ;;  %v256_v19 = vadd.f32 %v240_v7, %v224_v1  ;;  %v321_v20 = vadd.f32 %v305_v9, %v289_v2  ;;  %v242_v21 = vmul.f32 %v505_v11, %v114_v3  ;;  %v307_v22 = vadd.f32 %v505_v11, %v114_v3  ;;  %v231_v2 = vld [vmem:[#allocation2 + $0x38] sm:$0xff]  ;;  %v297_v11 = vld [vmem:[#allocation3 + $0x40] sm:$0xff] }
  0x45   :  { %v509_v23 = vpop.eup %508  ;;  %v257_v24 = vadd.f32 %v241_v12, %v225_v8  ;;  %v322_v25 = vadd.f32 %v306_v13, %v290_v10  ;;  %v186_v29 = vadd.f32 1.0, %v507_v18  ;;  %526 = vpow2.f32 %v170_v5  ;;  %v296_v3 = vld [vmem:[#allocation3 + $0x38] sm:$0xff]  ;;  %v232_v10 = vld [vmem:[#allocation2 + $0x40] sm:$0xff] }
  0x46   :  { %v511_v30 = vpop.eup %510  ;;  %273 = vst.msk [vmem:[#allocation2] sm:$0xff] %vm63_vm0, %v256_v19  ;;  %337 = vst.msk [vmem:[#allocation3] sm:$0xff] %vm63_vm0, %v321_v20  ;;  %v258_v31 = vadd.f32 %v242_v21, %v226_v14  ;;  %v323_v32 = vadd.f32 %v307_v22, %v291_v15  ;;  %v243_v33 = vmul.f32 %v509_v23, %v115_v16 }
  0x47   :  { %v308_v34 = vadd.f32 %v509_v23, %v115_v16  ;;  %v513_v37 = vpop.eup %512  ;;  %274 = vst.msk [vmem:[#allocation2 + $0x8] sm:$0xff] %vm63_vm0, %v257_v24  ;;  %338 = vst.msk [vmem:[#allocation3 + $0x8] sm:$0xff] %vm63_vm0, %v322_v25  ;;  %528 = vrcp.f32 %v186_v29  ;;  %v187_v41 = vadd.f32 1.0, %v511_v30  ;;  %v121_v24 = vld [vmem:[#allocation6 + $0x48] sm:$0xff] }
  0x48   :  { %v515_v43 = vpop.eup %514  ;;  %275 = vst.msk [vmem:[#allocation2 + $0x10] sm:$0xff] %vm63_vm0, %v258_v31  ;;  %339 = vst.msk [vmem:[#allocation3 + $0x10] sm:$0xff] %vm63_vm0, %v323_v32  ;;  %v259_v44 = vadd.f32 %v243_v33, %v227_v26  ;;  %v244_v46 = vmul.f32 %v513_v37, %v116_v28  ;;  %v309_v47 = vadd.f32 %v513_v37, %v116_v28  ;;  %v298_v37 = vld [vmem:[#allocation3 + $0x48] sm:$0xff] }
  0x49   :  { %v324_v45 = vadd.f32 %v308_v34, %v292_v27  ;;  %v517_v50 = vpop.eup %516  ;;  %v245_v51 = vmul.f32 %v515_v43, %v117_v35  ;;  %v310_v52 = vadd.f32 %v515_v43, %v117_v35  ;;  %530 = vrcp.f32 %v187_v41 }
  0x4a   :  { %v519_v57 = vpop.eup %518  ;;  %276 = vst.msk [vmem:[#allocation2 + $0x18] sm:$0xff] %vm63_vm0, %v259_v44  ;;  %v260_v58 = vadd.f32 %v244_v46, %v228_v38  ;;  %v325_v59 = vadd.f32 %v309_v47, %v293_v39  ;;  %v246_v60 = vmul.f32 %v517_v50, %v118_v40  ;;  %v311_v61 = vadd.f32 %v517_v50, %v118_v40  ;;  %v122_v38 = vld [vmem:[#allocation6 + $0x50] sm:$0xff] }
  0x4b   :  { %340 = vst.msk [vmem:[#allocation3 + $0x18] sm:$0xff] %vm63_vm0, %v324_v45  ;;  %v521_v63 = vpop.eup %520  ;;  %v261_v0 = vadd.f32 %v245_v51, %v229_v48  ;;  %v326_v1 = vadd.f32 %v310_v52, %v294_v49  ;;  %v188_v4 = vadd.f32 1.0, %v519_v57  ;;  %532 = vpow2.f32 %v172_v42  ;;  %v234_v49 = vld [vmem:[#allocation2 + $0x50] sm:$0xff]  ;;  %v123_v51 = vld [vmem:[#allocation6 + $0x58] sm:$0xff] }
  0x4c   :  { %v523_v5 = vpop.eup %522  ;;  %277 = vst.msk [vmem:[#allocation2 + $0x20] sm:$0xff] %vm63_vm0, %v260_v58  ;;  %341 = vst.msk [vmem:[#allocation3 + $0x20] sm:$0xff] %vm63_vm0, %v325_v59  ;;  %v262_v6 = vadd.f32 %v246_v60, %v230_v53  ;;  %v327_v7 = vadd.f32 %v311_v61, %v295_v54  ;;  %v247_v8 = vmul.f32 %v521_v63, %v119_v55  ;;  %v299_v50 = vld [vmem:[#allocation3 + $0x50] sm:$0xff] }
  0x4d   :  { %v312_v9 = vadd.f32 %v521_v63, %v119_v55  ;;  %v525_v12 = vpop.eup %524  ;;  %v356_v13 = vld [vmem:[#allocation2] sm:$0xff]  ;;  %278 = vst.msk [vmem:[#allocation2 + $0x28] sm:$0xff] %vm63_vm0, %v261_v0  ;;  %342 = vst.msk [vmem:[#allocation3 + $0x28] sm:$0xff] %vm63_vm0, %v326_v1  ;;  %v248_v15 = vmul.f32 %v523_v5, %v120_v62  ;;  %v313_v16 = vadd.f32 %v523_v5, %v120_v62  ;;  %534 = vrcp.f32 %v188_v4  ;;  %v235_v0 = vld [vmem:[#allocation2 + $0x58] sm:$0xff] }
  0x4e   :  { %v411_v14 = vld [vmem:[#allocation3] sm:$0xff]  ;;  %v372_v18 = vsel %vm63_vm0, %v356_v13, 0.0  ;;  %v357_v19 = vld [vmem:[#allocation2 + $0x8] sm:$0xff]  ;;  %279 = vst.msk [vmem:[#allocation2 + $0x30] sm:$0xff] %vm63_vm0, %v262_v6  ;;  %343 = vst.msk [vmem:[#allocation3 + $0x30] sm:$0xff] %vm63_vm0, %v327_v7  ;;  %v263_v22 = vadd.f32 %v247_v8, %v231_v2  ;;  %v249_v42 = vmul.f32 %v525_v12, %v121_v24  ;;  %v314_v43 = vadd.f32 %v525_v12, %v121_v24 }
  0x4f   :  { %v427_v20 = vsel %vm63_vm0, %v411_v14, 0.0  ;;  %v412_v21 = vld [vmem:[#allocation3 + $0x8] sm:$0xff]  ;;  %v328_v23 = vadd.f32 %v312_v9, %v296_v3  ;;  %v527_v25 = vpop.eup %526  ;;  %v373_v26 = vsel %vm63_vm0, %v357_v19, 0.0  ;;  %v358_v28 = vld [vmem:[#allocation2 + $0x10] sm:$0xff]  ;;  %v264_v30 = vadd.f32 %v248_v15, %v232_v10  ;;  %v300_v1 = vld [vmem:[#allocation3 + $0x58] sm:$0xff] }
  0x50   :  { %v428_v27 = vsel %vm63_vm0, %v412_v21, 0.0  ;;  %v413_v29 = vld [vmem:[#allocation3 + $0x10] sm:$0xff]  ;;  %v329_v31 = vadd.f32 %v313_v16, %v297_v11  ;;  %v374_v32 = vadd.f32 %v373_v26, %v372_v18  ;;  %v375_v34 = vsel %vm63_vm0, %v358_v28, 0.0  ;;  %280 = vst.msk [vmem:[#allocation2 + $0x38] sm:$0xff] %vm63_vm0, %v263_v22  ;;  %v124_v7 = vld [vmem:[#allocation6 + $0x60] sm:$0xff] }
  0x51   :  { %v429_v33 = vadd.f32 %v428_v27, %v427_v20  ;;  %v430_v35 = vsel %vm63_vm0, %v413_v29, 0.0  ;;  %344 = vst.msk [vmem:[#allocation3 + $0x38] sm:$0xff] %vm63_vm0, %v328_v23  ;;  %v529_v39 = vpop.eup %528  ;;  %v359_v40 = vld [vmem:[#allocation2 + $0x18] sm:$0xff]  ;;  %281 = vst.msk [vmem:[#allocation2 + $0x40] sm:$0xff] %vm63_vm0, %v264_v30  ;;  %v189_v44 = vadd.f32 1.0, %v527_v25  ;;  %536 = vpow2.f32 %v174_v17  ;;  %v236_v17 = vld [vmem:[#allocation2 + $0x60] sm:$0xff] }
  0x52   :  { %v414_v41 = vld [vmem:[#allocation3 + $0x18] sm:$0xff]  ;;  %345 = vst.msk [vmem:[#allocation3 + $0x40] sm:$0xff] %vm63_vm0, %v329_v31  ;;  %v376_v45 = vadd.f32 %v375_v34, %v374_v32  ;;  %v377_v47 = vsel %vm63_vm0, %v359_v40, 0.0  ;;  %v265_v55 = vadd.f32 %v249_v42, %v233_v36  ;;  %v330_v56 = vadd.f32 %v314_v43, %v298_v37  ;;  %v301_v18 = vld [vmem:[#allocation3 + $0x60] sm:$0xff] }
  0x53   :  { %v431_v46 = vadd.f32 %v430_v35, %v429_v33  ;;  %v432_v48 = vsel %vm63_vm0, %v414_v41, 0.0  ;;  %v531_v52 = vpop.eup %530  ;;  %v360_v53 = vld [vmem:[#allocation2 + $0x20] sm:$0xff]  ;;  %v250_v57 = vmul.f32 %v529_v39, %v122_v38  ;;  %v315_v58 = vadd.f32 %v529_v39, %v122_v38 }
  0x54   :  { %v415_v54 = vld [vmem:[#allocation3 + $0x20] sm:$0xff]  ;;  %v378_v59 = vadd.f32 %v377_v47, %v376_v45  ;;  %v379_v61 = vsel %vm63_vm0, %v360_v53, 0.0  ;;  %v361_v63 = vld [vmem:[#allocation2 + $0x28] sm:$0xff]  ;;  %282 = vst.msk [vmem:[#allocation2 + $0x48] sm:$0xff] %vm63_vm0, %v265_v55  ;;  %346 = vst.msk [vmem:[#allocation3 + $0x48] sm:$0xff] %vm63_vm0, %v330_v56  ;;  %v251_v5 = vmul.f32 %v531_v52, %v123_v51  ;;  %v316_v6 = vadd.f32 %v531_v52, %v123_v51 }
  0x55   :  { %v433_v60 = vadd.f32 %v432_v48, %v431_v46  ;;  %v434_v62 = vsel %vm63_vm0, %v415_v54, 0.0  ;;  %v533_v2 = vpop.eup %532  ;;  %v266_v3 = vadd.f32 %v250_v57, %v234_v49  ;;  %v331_v4 = vadd.f32 %v315_v58, %v299_v50  ;;  %v362_v8 = vld [vmem:[#allocation2 + $0x30] sm:$0xff]  ;;  %v416_v9 = vld [vmem:[#allocation3 + $0x28] sm:$0xff] }
  0x56   :  { %538 = vrcp.f32 %v189_v44  ;;  %v190_v10 = vadd.f32 1.0, %v533_v2  ;;  %v380_v11 = vadd.f32 %v379_v61, %v378_v59  ;;  %v381_v12 = vsel %vm63_vm0, %v361_v63, 0.0  ;;  %v417_v13 = vld [vmem:[#allocation3 + $0x30] sm:$0xff]  ;;  %v125_v45 = vld [vmem:[#allocation6 + $0x68] sm:$0xff] }
  0x57   :  { %v535_v14 = vpop.eup %534  ;;  %283 = vst.msk [vmem:[#allocation2 + $0x50] sm:$0xff] %vm63_vm0, %v266_v3  ;;  %347 = vst.msk [vmem:[#allocation3 + $0x50] sm:$0xff] %vm63_vm0, %v331_v4  ;;  %v267_v15 = vadd.f32 %v251_v5, %v235_v0  ;;  %v332_v16 = vadd.f32 %v316_v6, %v300_v1  ;;  %v363_v19 = vld [vmem:[#allocation2 + $0x38] sm:$0xff]  ;;  %v383_v20 = vsel %vm63_vm0, %v362_v8, 0.0  ;;  %v435_v21 = vadd.f32 %v434_v62, %v433_v60  ;;  %v237_v50 = vld [vmem:[#allocation2 + $0x68] sm:$0xff] }
  0x58   :  { %v252_v22 = vmul.f32 %v535_v14, %v124_v7  ;;  %v317_v23 = vadd.f32 %v535_v14, %v124_v7  ;;  %540 = vrcp.f32 %v190_v10  ;;  %v364_v24 = vld [vmem:[#allocation2 + $0x40] sm:$0xff]  ;;  %v382_v25 = vadd.f32 %v381_v12, %v380_v11  ;;  %v418_v26 = vld [vmem:[#allocation3 + $0x38] sm:$0xff]  ;;  %v302_v51 = vld [vmem:[#allocation3 + $0x68] sm:$0xff] }
  0x59   :  { %284 = vst.msk [vmem:[#allocation2 + $0x58] sm:$0xff] %vm63_vm0, %v267_v15  ;;  %348 = vst.msk [vmem:[#allocation3 + $0x58] sm:$0xff] %vm63_vm0, %v332_v16  ;;  %v385_v27 = vsel %vm63_vm0, %v363_v19, 0.0  ;;  %v436_v28 = vsel %vm63_vm0, %v416_v9, 0.0  ;;  %v438_v29 = vsel %vm63_vm0, %v417_v13, 0.0  ;;  %v419_v33 = vld [vmem:[#allocation3 + $0x40] sm:$0xff] }
  0x5a   :  { %v268_v30 = vadd.f32 %v252_v22, %v236_v17  ;;  %v333_v31 = vadd.f32 %v317_v23, %v301_v18  ;;  %v384_v32 = vadd.f32 %v383_v20, %v382_v25  ;;  %v437_v34 = vadd.f32 %v436_v28, %v435_v21  ;;  %v126_v55 = vld [vmem:[#allocation6 + $0x70] sm:$0xff]  ;;  %v127_v15 = vld [vmem:[#allocation6 + $0x78] sm:$0xff] }
  0x5b   :  { %v537_v35 = vpop.eup %536  ;;  %v387_v36 = vsel %vm63_vm0, %v364_v24, 0.0  ;;  %v440_v37 = vsel %vm63_vm0, %v418_v26, 0.0  ;;  %v365_v39 = vld [vmem:[#allocation2 + $0x48] sm:$0xff]  ;;  %v442_v44 = vsel %vm63_vm0, %v419_v33, 0.0  ;;  %v238_v0 = vld [vmem:[#allocation2 + $0x70] sm:$0xff]  ;;  %v239_v21 = vld [vmem:[#allocation2 + $0x78] sm:$0xff] }
  0x5c   :  { %285 = vst.msk [vmem:[#allocation2 + $0x60] sm:$0xff] %vm63_vm0, %v268_v30  ;;  %349 = vst.msk [vmem:[#allocation3 + $0x60] sm:$0xff] %vm63_vm0, %v333_v31  ;;  %v191_v38 = vadd.f32 1.0, %v537_v35  ;;  %v386_v40 = vadd.f32 %v385_v27, %v384_v32  ;;  %v420_v41 = vld [vmem:[#allocation3 + $0x48] sm:$0xff]  ;;  %v439_v42 = vadd.f32 %v438_v29, %v437_v34  ;;  %v389_v43 = vsel %vm63_vm0, %v365_v39, 0.0  ;;  %v303_v1 = vld [vmem:[#allocation3 + $0x70] sm:$0xff] }
  0x5d   :  { %v444_v53 = vsel %vm63_vm0, %v420_v41, 0.0  ;;  %v304_v22 = vld [vmem:[#allocation3 + $0x78] sm:$0xff] }
  0x5e   :  { %542 = vrcp.f32 %v191_v38  ;;  %v366_v46 = vld [vmem:[#allocation2 + $0x50] sm:$0xff]  ;;  %v388_v47 = vadd.f32 %v387_v36, %v386_v40  ;;  %v441_v49 = vadd.f32 %v440_v37, %v439_v42 }
  0x5f   :  { %v421_v48 = vld [vmem:[#allocation3 + $0x50] sm:$0xff]  ;;  %v391_v52 = vsel %vm63_vm0, %v366_v46, 0.0 }
  0x60   :  { %v539_v54 = vpop.eup %538  ;;  %v367_v56 = vld [vmem:[#allocation2 + $0x58] sm:$0xff]  ;;  %v390_v57 = vadd.f32 %v389_v43, %v388_v47  ;;  %v443_v59 = vadd.f32 %v442_v44, %v441_v49  ;;  %v446_v62 = vsel %vm63_vm0, %v421_v48, 0.0 }
  0x61   :  { %v422_v58 = vld [vmem:[#allocation3 + $0x58] sm:$0xff]  ;;  %v253_v60 = vmul.f32 %v539_v54, %v125_v45  ;;  %v318_v61 = vadd.f32 %v539_v54, %v125_v45  ;;  %v393_v3 = vsel %vm63_vm0, %v367_v56, 0.0 }
  0x62   :  { %v541_v63 = vpop.eup %540  ;;  %v392_v2 = vadd.f32 %v391_v52, %v390_v57  ;;  %v445_v4 = vadd.f32 %v444_v53, %v443_v59  ;;  %v448_v5 = vsel %vm63_vm0, %v422_v58, 0.0 }
  0x63   :  { %v269_v6 = vadd.f32 %v253_v60, %v237_v50  ;;  %v334_v7 = vadd.f32 %v318_v61, %v302_v51  ;;  %v254_v8 = vmul.f32 %v541_v63, %v126_v55  ;;  %v319_v9 = vadd.f32 %v541_v63, %v126_v55  ;;  %v368_v10 = vld [vmem:[#allocation2 + $0x60] sm:$0xff] }
  0x64   :  { %v423_v11 = vld [vmem:[#allocation3 + $0x60] sm:$0xff]  ;;  %v447_v12 = vadd.f32 %v446_v62, %v445_v4  ;;  %v394_v16 = vadd.f32 %v393_v3, %v392_v2  ;;  %v395_v18 = vsel %vm63_vm0, %v368_v10, 0.0 }
  0x65   :  { %286 = vst.msk [vmem:[#allocation2 + $0x68] sm:$0xff] %vm63_vm0, %v269_v6  ;;  %350 = vst.msk [vmem:[#allocation3 + $0x68] sm:$0xff] %vm63_vm0, %v334_v7  ;;  %v270_v13 = vadd.f32 %v254_v8, %v238_v0  ;;  %v335_v14 = vadd.f32 %v319_v9, %v303_v1  ;;  %v450_v19 = vsel %vm63_vm0, %v423_v11, 0.0 }
  0x66   :  { %v449_v17 = vadd.f32 %v448_v5, %v447_v12  ;;  %v396_v25 = vadd.f32 %v395_v18, %v394_v16 }
  0x67   :  { %287 = vst.msk [vmem:[#allocation2 + $0x70] sm:$0xff] %vm63_vm0, %v270_v13  ;;  %351 = vst.msk [vmem:[#allocation3 + $0x70] sm:$0xff] %vm63_vm0, %v335_v14 }
  0x68   :  { %v543_v20 = vpop.eup %542  ;;  %v451_v26 = vadd.f32 %v450_v19, %v449_v17 }
  0x69   :  { %v255_v23 = vmul.f32 %v543_v20, %v127_v15  ;;  %v320_v24 = vadd.f32 %v543_v20, %v127_v15 }
  0x6b   :  { %v271_v27 = vadd.f32 %v255_v23, %v239_v21  ;;  %v336_v28 = vadd.f32 %v320_v24, %v304_v22 }
  0x6c   :  { %v369_v29 = vld [vmem:[#allocation2 + $0x68] sm:$0xff] }
  0x6d   :  { %v424_v30 = vld [vmem:[#allocation3 + $0x68] sm:$0xff]  ;;  %288 = vst.msk [vmem:[#allocation2 + $0x78] sm:$0xff] %vm63_vm0, %v271_v27  ;;  %352 = vst.msk [vmem:[#allocation3 + $0x78] sm:$0xff] %vm63_vm0, %v336_v28  ;;  %v397_v31 = vsel %vm63_vm0, %v369_v29, 0.0 }
  0x6e   :  { %v452_v32 = vsel %vm63_vm0, %v424_v30, 0.0  ;;  %v370_v33 = vld [vmem:[#allocation2 + $0x70] sm:$0xff]  ;;  %v398_v34 = vadd.f32 %v397_v31, %v396_v25 }
  0x6f   :  { %v425_v35 = vld [vmem:[#allocation3 + $0x70] sm:$0xff]  ;;  %v453_v36 = vadd.f32 %v452_v32, %v451_v26  ;;  %v399_v37 = vsel %vm63_vm0, %v370_v33, 0.0 }
  0x70   :  { %v454_v38 = vsel %vm63_vm0, %v425_v35, 0.0  ;;  %v400_v39 = vadd.f32 %v399_v37, %v398_v34 }
  0x71   :  { %v455_v40 = vadd.f32 %v454_v38, %v453_v36 }
  0x74   :  { %v371_v41 = vld [vmem:[#allocation2 + $0x78] sm:$0xff] }
  0x75   :  { %v426_v42 = vld [vmem:[#allocation3 + $0x78] sm:$0xff]  ;;  %v401_v43 = vsel %vm63_vm0, %v371_v41, 0.0 }
  0x76   :  { %v456_v44 = vsel %vm63_vm0, %v426_v42, 0.0  ;;  %v402_v45 = vadd.f32 %v401_v43, %v400_v39 }
  0x77   :  { %v457_v46 = vadd.f32 %v456_v44, %v455_v40 }
  0x78   :  { %v403_v47 = vrot.slane %v402_v45, 4 }
  0x79   :  { %v458_v48 = vrot.slane %v457_v46, 4 }
  0x7a   :  { %v404_v49 = vadd.f32 %v403_v47, %v402_v45 }
  0x7b   :  { %v459_v50 = vadd.f32 %v458_v48, %v457_v46 }
  0x7c   :  { %v405_v51 = vrot.slane %v404_v49, 2 }
  0x7d   :  { %v460_v52 = vrot.slane %v459_v50, 2 }
  0x7e   :  { %v406_v53 = vadd.f32 %v405_v51, %v404_v49 }
  0x7f   :  { %v461_v54 = vadd.f32 %v460_v52, %v459_v50 }
  0x80   :  { %v407_v55 = vrot.slane %v406_v53, 1 }
  0x81   :  { %v462_v56 = vrot.slane %v461_v54, 1 }
  0x82   :  { %v408_v57 = vadd.f32 %v407_v55, %v406_v53 }
  0x83   :  { %v463_v58 = vadd.f32 %v462_v56, %v461_v54 }
  0x84   :  { %410 = vst.msk [vmem:[%s740_s2] sm:$0x1] %vm409_vm1, %v408_v57 }
  0x85   :  { %464 = vst.msk [vmem:[%s740_s2 + $0x1] sm:$0x1] %vm409_vm1, %v463_v58 }
  0x86   :  { %469 = vsyncpa [#allocation5], 1 }
  0x87   :  { %470 = vsyncpa [#allocation7], 1 }

</bundles_post_ra>
